<compile_context>
chip_gen: v7x
topology: tpu7x:2x2x1
jax: 0.10.0
libtpu: 0.0.40
codegen_flags: <defaults>
</compile_context>

<pallas_src>
import jax
import jax.numpy as jnp
from jax import lax
from jax.experimental import pallas as pl
from jax.experimental.pallas import tpu as pltpu


# ----------------------------------------------------------------------------
# Fused 3-layer GCN kernel (one batch element per grid step)
# ----------------------------------------------------------------------------
def _gcn_fused_kernel(x_ref, fwA_ref, bwA_ref,
                      w1_ref, wuc_ref, wuf_ref, wub_ref,
                      cb_ref, fb_ref, bb_ref, ub_ref,
                      out_ref):
    x = x_ref[0]            # (N, C)  node-major states, channels on lanes
    A_fw = fwA_ref[0]       # (N, N)
    A_bw = bwA_ref[0]       # (N, N)

    n_layers = w1_ref.shape[0]
    S = cb_ref.shape[-1]
    # contraction over dim 0 of both operands => A^T @ t (MXU trans_a path, no copy)
    contract_first = (((0,), (0,)), ((), ()))

    for l in range(n_layers):   # unrolled; the state slab never leaves VMEM
        # fused condense/fw/bw channel-mixing conv (BN scales pre-folded into w1)
        h = jnp.dot(x, w1_ref[l], preferred_element_type=jnp.float32)   # (N, 3S)

        cond = jnp.maximum(h[:, 0:S] + cb_ref[l], 0.0)                  # (N, S)

        # graph message passing:  fw[n, s] = sum_m A_fw[m, n] * t_fw[m, s]
        fw = lax.dot_general(A_fw, h[:, S:2 * S], contract_first,
                             preferred_element_type=jnp.float32)
        bw = lax.dot_general(A_bw, h[:, 2 * S:3 * S], contract_first,
                             preferred_element_type=jnp.float32)
        fw = jnp.maximum(fw + fb_ref[l], 0.0)
        bw = jnp.maximum(bw + bb_ref[l], 0.0)

        # update conv split into three accumulated dots (no concat copy);
        # update-BN scale folded into the weights, only bias remains.
        upd = (jnp.dot(cond, wuc_ref[l], preferred_element_type=jnp.float32)
               + jnp.dot(fw, wuf_ref[l], preferred_element_type=jnp.float32)
               + jnp.dot(bw, wub_ref[l], preferred_element_type=jnp.float32)
               + ub_ref[l])

        # TODO(synk): nn.Dropout(0.5) treated as identity (eval/inference mode).
        x = jnp.maximum(upd + x, 0.0)        # residual + ReLU

    out_ref[0] = x


def gcn_forward(states, fw_A, bw_A, packed):
    """GCN.forward: states (B, N, C) -> (B, N, C). Adjacency: (B, N, N)."""
    B, N, C = states.shape

    param_order = ("w1", "wuc", "wuf", "wub", "cb", "fb", "bb", "ub")
    param_arrays = [packed[k] for k in param_order]

    def per_batch(shape):
        nd = len(shape)
        return pl.BlockSpec(shape, lambda b, _nd=nd: (b,) + (0,) * (_nd - 1))

    def full(arr):
        nd = arr.ndim
        return pl.BlockSpec(arr.shape, lambda b, _nd=nd: (0,) * _nd)

    # Rough resident-VMEM estimate (f32, double-buffered in/out + params), with headroom.
    est_bytes = 4 * (2 * 2 * (N * C) + 2 * 2 * 2 * (N * N)
                     + 2 * sum(int(a.size) for a in param_arrays))
    vmem_limit = int(min(max(4 * est_bytes, 16 * 2 ** 20), 64 * 2 ** 20))

    return pl.pallas_call(
        _gcn_fused_kernel,
        out_shape=jax.ShapeDtypeStruct((B, N, C), jnp.float32),
        grid=(B,),
        in_specs=[per_batch((1, N, C)),
                  per_batch((1, N, N)),
                  per_batch((1, N, N))] + [full(a) for a in param_arrays],
        out_specs=per_batch((1, N, C)),
        compiler_params=pltpu.CompilerParams(
            dimension_semantics=("parallel",),
            vmem_limit_bytes=vmem_limit),
    )(states, fw_A, bw_A, *param_arrays)


# ----------------------------------------------------------------------------
# Parameter construction (PyTorch-equivalent raw params) and packing
# ----------------------------------------------------------------------------
def _bn_stats(key, ch):
    k1, k2, k3, k4 = jax.random.split(key, 4)
    gamma = 1.0 + 0.1 * jax.random.normal(k1, (ch,), jnp.float32)
    beta = 0.1 * jax.random.normal(k2, (ch,), jnp.float32)
    mean = 0.1 * jax.random.normal(k3, (ch,), jnp.float32)
    var = jnp.abs(jax.random.normal(k4, (ch,), jnp.float32)) + 0.5
    return gamma, beta, mean, var


def init_gc_layer(key, in_size, state_size):
    ks = jax.random.split(key, 8)
    return {
        "wc": 0.1 * jax.random.normal(ks[0], (state_size, in_size), jnp.float32),
        "wf": 0.1 * jax.random.normal(ks[1], (state_size, in_size), jnp.float32),
        "wb": 0.1 * jax.random.normal(ks[2], (state_size, in_size), jnp.float32),
        "wu": 0.1 * jax.random.normal(ks[3], (in_size, 3 * state_size), jnp.float32),
        "condense_norm": _bn_stats(ks[4], state_size),
        "fw_norm": _bn_stats(ks[5], state_size),
        "bw_norm": _bn_stats(ks[6], state_size),
        "update_norm": _bn_stats(ks[7], in_size),
    }


def _fold_bn(stats, eps=1e-5):
    gamma, beta, mean, var = stats
    scale = gamma / jnp.sqrt(var + eps)
    bias = beta - mean * scale
    return scale, bias


def pack_params(layer_params):
    """One-time constant fold: BN scales into conv weights, stack + pre-transpose."""
    w1, wuc, wuf, wub, cb, fb, bb, ub = ([] for _ in range(8))
    for p in layer_params:
        cs, cbias = _fold_bn(p["condense_norm"])
        fs, fbias = _fold_bn(p["fw_norm"])
        bs, bbias = _fold_bn(p["bw_norm"])
        us, ubias = _fold_bn(p["update_norm"])
        S = p["wc"].shape[0]

        # stacked condense/fw/bw conv weight, BN scales folded, pre-transposed -> (C, 3S)
        wcfb = jnp.concatenate([p["wc"] * cs[:, None],
                                p["wf"] * fs[:, None],
                                p["wb"] * bs[:, None]], axis=0).T
        # update conv with update-BN scale folded, split per branch, pre-transposed -> (S, C)
        wu_s = p["wu"] * us[:, None]
        w1.append(wcfb)
        wuc.append(wu_s[:, 0 * S:1 * S].T)
        wuf.append(wu_s[:, 1 * S:2 * S].T)
        wub.append(wu_s[:, 2 * S:3 * S].T)
        cb.append(cbias[None, :])
        fb.append(fbias[None, :])
        bb.append(bbias[None, :])
        ub.append(ubias[None, :])
    return {"w1": jnp.stack(w1), "wuc": jnp.stack(wuc), "wuf": jnp.stack(wuf),
            "wub": jnp.stack(wub), "cb": jnp.stack(cb), "fb": jnp.stack(fb),
            "bb": jnp.stack(bb), "ub": jnp.stack(ub)}


# ----------------------------------------------------------------------------
# Pure-JAX reference (mirrors the PyTorch forward in channel-major layout)
# ----------------------------------------------------------------------------
def gcn_reference(states, fw_A, bw_A, layer_params, eps=1e-5):
    x = jnp.transpose(states, (0, 2, 1))   # (B, C, N)

    def bn(t, stats):
        gamma, beta, mean, var = stats
        scale = gamma / jnp.sqrt(var + eps)
        return t * scale[None, :, None] + (beta - mean * scale)[None, :, None]

    for p in layer_params:
        cond = jax.nn.relu(bn(jnp.einsum("sc,bcn->bsn", p["wc"], x), p["condense_norm"]))
        fw = jnp.einsum("bsn,bnm->bsm", jnp.einsum("sc,bcn->bsn", p["wf"], x), fw_A)
        fw = jax.nn.relu(bn(fw, p["fw_norm"]))
        bw = jnp.einsum("bsn,bnm->bsm", jnp.einsum("sc,bcn->bsn", p["wb"], x), bw_A)
        bw = jax.nn.relu(bn(bw, p["bw_norm"]))
        cat = jnp.concatenate([cond, fw, bw], axis=1)
        upd = bn(jnp.einsum("ck,bkn->bcn", p["wu"], cat), p["update_norm"])
        x = jax.nn.relu(upd + x)
    return jnp.transpose(x, (0, 2, 1))


if __name__ == "__main__":
    B, N, IN_SIZE, STATE_SIZE = 2, 8, 32, 16

    root = jax.random.PRNGKey(0)
    k_states, k_fw, k_bw, k_p1, k_p2, k_p3 = jax.random.split(root, 6)

    states = jax.random.normal(k_states, (B, N, IN_SIZE), jnp.float32)
    fw_A = jax.random.uniform(k_fw, (B, N, N), jnp.float32)
    bw_A = jnp.transpose(fw_A, (0, 2, 1))
    fw_A = fw_A / jnp.sum(fw_A, axis=1, keepdims=True)
    bw_A = bw_A / jnp.sum(bw_A, axis=1, keepdims=True)

    layer_params = [init_gc_layer(k, IN_SIZE, STATE_SIZE) for k in (k_p1, k_p2, k_p3)]
    packed = pack_params(layer_params)

    out = gcn_forward(states, fw_A, bw_A, packed)
    out = jax.block_until_ready(out)
    assert out.shape == (B, N, IN_SIZE)

    # Sanity check against the pure-JAX reference (loose tol: MXU f32 matmul precision).
    ref = gcn_reference(states, fw_A, bw_A, layer_params)
    assert bool(jnp.allclose(out, ref, rtol=5e-2, atol=5e-2)), "kernel/reference mismatch"

    print("KERNEL_OK")
</pallas_src>

<mosaic_0001>
module attributes {stable_mosaic.version = 11 : i64} {
  func.func @_gcn_fused_kernel(%arg0: i32, %arg1: memref<1x8x32xf32, #tpu.memory_space<vmem>>, %arg2: memref<1x8x8xf32, #tpu.memory_space<vmem>>, %arg3: memref<1x8x8xf32, #tpu.memory_space<vmem>>, %arg4: memref<3x32x48xf32, #tpu.memory_space<vmem>>, %arg5: memref<3x16x32xf32, #tpu.memory_space<vmem>>, %arg6: memref<3x16x32xf32, #tpu.memory_space<vmem>>, %arg7: memref<3x16x32xf32, #tpu.memory_space<vmem>>, %arg8: memref<3x1x16xf32, #tpu.memory_space<vmem>>, %arg9: memref<3x1x16xf32, #tpu.memory_space<vmem>>, %arg10: memref<3x1x16xf32, #tpu.memory_space<vmem>>, %arg11: memref<3x1x32xf32, #tpu.memory_space<vmem>>, %arg12: memref<1x8x32xf32, #tpu.memory_space<vmem>>) attributes {dimension_semantics = [#tpu.dimension_semantics<parallel>], iteration_bounds = array<i64: 2>, scalar_prefetch = 0 : i64, scratch_operands = 0 : i64, tpu.core_type = #tpu.core_type<tc>, window_params = [{transform_indices = @transform_0, window_bounds = array<i64: 1, 8, 32>}, {transform_indices = @transform_1, window_bounds = array<i64: 1, 8, 8>}, {transform_indices = @transform_2, window_bounds = array<i64: 1, 8, 8>}, {pipeline_mode = #tpu.pipeline_mode<synchronous>, transform_indices = @transform_3, window_bounds = array<i64: 3, 32, 48>}, {pipeline_mode = #tpu.pipeline_mode<synchronous>, transform_indices = @transform_4, window_bounds = array<i64: 3, 16, 32>}, {pipeline_mode = #tpu.pipeline_mode<synchronous>, transform_indices = @transform_5, window_bounds = array<i64: 3, 16, 32>}, {pipeline_mode = #tpu.pipeline_mode<synchronous>, transform_indices = @transform_6, window_bounds = array<i64: 3, 16, 32>}, {pipeline_mode = #tpu.pipeline_mode<synchronous>, transform_indices = @transform_7, window_bounds = array<i64: 3, 1, 16>}, {pipeline_mode = #tpu.pipeline_mode<synchronous>, transform_indices = @transform_8, window_bounds = array<i64: 3, 1, 16>}, {pipeline_mode = #tpu.pipeline_mode<synchronous>, transform_indices = @transform_9, window_bounds = array<i64: 3, 1, 16>}, {pipeline_mode = #tpu.pipeline_mode<synchronous>, transform_indices = @transform_10, window_bounds = array<i64: 3, 1, 32>}, {transform_indices = @transform_11, window_bounds = array<i64: 1, 8, 32>}]} {
    %c0 = arith.constant 0 : index
    %c0_0 = arith.constant 0 : index
    %c0_1 = arith.constant 0 : index
    %0 = vector.load %arg1[%c0, %c0_0, %c0_1] : memref<1x8x32xf32, #tpu.memory_space<vmem>>, vector<1x8x32xf32>
    %1 = vector.shape_cast %0 : vector<1x8x32xf32> to vector<8x32xf32>
    %c0_2 = arith.constant 0 : index
    %c0_3 = arith.constant 0 : index
    %c0_4 = arith.constant 0 : index
    %2 = vector.load %arg2[%c0_2, %c0_3, %c0_4] : memref<1x8x8xf32, #tpu.memory_space<vmem>>, vector<1x8x8xf32>
    %3 = vector.shape_cast %2 : vector<1x8x8xf32> to vector<8x8xf32>
    %c0_5 = arith.constant 0 : index
    %c0_6 = arith.constant 0 : index
    %c0_7 = arith.constant 0 : index
    %4 = vector.load %arg3[%c0_5, %c0_6, %c0_7] : memref<1x8x8xf32, #tpu.memory_space<vmem>>, vector<1x8x8xf32>
    %5 = vector.shape_cast %4 : vector<1x8x8xf32> to vector<8x8xf32>
    %c0_8 = arith.constant 0 : index
    %c0_9 = arith.constant 0 : index
    %c0_10 = arith.constant 0 : index
    %6 = vector.load %arg4[%c0_8, %c0_9, %c0_10] : memref<3x32x48xf32, #tpu.memory_space<vmem>>, vector<1x32x48xf32>
    %7 = vector.shape_cast %6 : vector<1x32x48xf32> to vector<32x48xf32>
    %cst = arith.constant dense<0.000000e+00> : vector<8x48xf32>
    %8 = tpu.matmul %1, %7, %cst {dimension_numbers = #tpu.dot_dimension_numbers<[1], [0], [0], [1], [0, 0, 1, 1], [], []>} : vector<8x32xf32>, vector<32x48xf32>, vector<8x48xf32> -> vector<8x48xf32>
    %9 = vector.extract_strided_slice %8 {offsets = [0, 0], sizes = [8, 16], strides = [1, 1]} : vector<8x48xf32> to vector<8x16xf32>
    %c0_11 = arith.constant 0 : index
    %c0_12 = arith.constant 0 : index
    %c0_13 = arith.constant 0 : index
    %10 = vector.load %arg8[%c0_11, %c0_12, %c0_13] : memref<3x1x16xf32, #tpu.memory_space<vmem>>, vector<1x1x16xf32>
    %11 = vector.shape_cast %10 : vector<1x1x16xf32> to vector<1x16xf32>
    %12 = vector.broadcast %11 : vector<1x16xf32> to vector<8x16xf32>
    %13 = arith.addf %9, %12 : vector<8x16xf32>
    %cst_14 = arith.constant 0.000000e+00 : f32
    %14 = vector.broadcast %cst_14 : f32 to vector<8x16xf32>
    %15 = arith.maximumf %13, %14 : vector<8x16xf32>
    %16 = vector.extract_strided_slice %8 {offsets = [0, 16], sizes = [8, 16], strides = [1, 1]} : vector<8x48xf32> to vector<8x16xf32>
    %cst_15 = arith.constant dense<0.000000e+00> : vector<8x16xf32>
    %17 = tpu.matmul %3, %16, %cst_15 {dimension_numbers = #tpu.dot_dimension_numbers<[0], [0], [1], [1], [0, 1, 1, 1], [], []>} : vector<8x8xf32>, vector<8x16xf32>, vector<8x16xf32> -> vector<8x16xf32>
    %18 = vector.extract_strided_slice %8 {offsets = [0, 32], sizes = [8, 16], strides = [1, 1]} : vector<8x48xf32> to vector<8x16xf32>
    %cst_16 = arith.constant dense<0.000000e+00> : vector<8x16xf32>
    %19 = tpu.matmul %5, %18, %cst_16 {dimension_numbers = #tpu.dot_dimension_numbers<[0], [0], [1], [1], [0, 1, 1, 1], [], []>} : vector<8x8xf32>, vector<8x16xf32>, vector<8x16xf32> -> vector<8x16xf32>
    %c0_17 = arith.constant 0 : index
    %c0_18 = arith.constant 0 : index
    %c0_19 = arith.constant 0 : index
    %20 = vector.load %arg9[%c0_17, %c0_18, %c0_19] : memref<3x1x16xf32, #tpu.memory_space<vmem>>, vector<1x1x16xf32>
    %21 = vector.shape_cast %20 : vector<1x1x16xf32> to vector<1x16xf32>
    %22 = vector.broadcast %21 : vector<1x16xf32> to vector<8x16xf32>
    %23 = arith.addf %17, %22 : vector<8x16xf32>
    %cst_20 = arith.constant 0.000000e+00 : f32
    %24 = vector.broadcast %cst_20 : f32 to vector<8x16xf32>
    %25 = arith.maximumf %23, %24 : vector<8x16xf32>
    %c0_21 = arith.constant 0 : index
    %c0_22 = arith.constant 0 : index
    %c0_23 = arith.constant 0 : index
    %26 = vector.load %arg10[%c0_21, %c0_22, %c0_23] : memref<3x1x16xf32, #tpu.memory_space<vmem>>, vector<1x1x16xf32>
    %27 = vector.shape_cast %26 : vector<1x1x16xf32> to vector<1x16xf32>
    %28 = vector.broadcast %27 : vector<1x16xf32> to vector<8x16xf32>
    %29 = arith.addf %19, %28 : vector<8x16xf32>
    %cst_24 = arith.constant 0.000000e+00 : f32
    %30 = vector.broadcast %cst_24 : f32 to vector<8x16xf32>
    %31 = arith.maximumf %29, %30 : vector<8x16xf32>
    %c0_25 = arith.constant 0 : index
    %c0_26 = arith.constant 0 : index
    %c0_27 = arith.constant 0 : index
    %32 = vector.load %arg5[%c0_25, %c0_26, %c0_27] : memref<3x16x32xf32, #tpu.memory_space<vmem>>, vector<1x16x32xf32>
    %33 = vector.shape_cast %32 : vector<1x16x32xf32> to vector<16x32xf32>
    %cst_28 = arith.constant dense<0.000000e+00> : vector<8x32xf32>
    %34 = tpu.matmul %15, %33, %cst_28 {dimension_numbers = #tpu.dot_dimension_numbers<[1], [0], [0], [1], [0, 0, 1, 1], [], []>} : vector<8x16xf32>, vector<16x32xf32>, vector<8x32xf32> -> vector<8x32xf32>
    %c0_29 = arith.constant 0 : index
    %c0_30 = arith.constant 0 : index
    %c0_31 = arith.constant 0 : index
    %35 = vector.load %arg6[%c0_29, %c0_30, %c0_31] : memref<3x16x32xf32, #tpu.memory_space<vmem>>, vector<1x16x32xf32>
    %36 = vector.shape_cast %35 : vector<1x16x32xf32> to vector<16x32xf32>
    %cst_32 = arith.constant dense<0.000000e+00> : vector<8x32xf32>
    %37 = tpu.matmul %25, %36, %cst_32 {dimension_numbers = #tpu.dot_dimension_numbers<[1], [0], [0], [1], [0, 0, 1, 1], [], []>} : vector<8x16xf32>, vector<16x32xf32>, vector<8x32xf32> -> vector<8x32xf32>
    %38 = arith.addf %34, %37 : vector<8x32xf32>
    %c0_33 = arith.constant 0 : index
    %c0_34 = arith.constant 0 : index
    %c0_35 = arith.constant 0 : index
    %39 = vector.load %arg7[%c0_33, %c0_34, %c0_35] : memref<3x16x32xf32, #tpu.memory_space<vmem>>, vector<1x16x32xf32>
    %40 = vector.shape_cast %39 : vector<1x16x32xf32> to vector<16x32xf32>
    %cst_36 = arith.constant dense<0.000000e+00> : vector<8x32xf32>
    %41 = tpu.matmul %31, %40, %cst_36 {dimension_numbers = #tpu.dot_dimension_numbers<[1], [0], [0], [1], [0, 0, 1, 1], [], []>} : vector<8x16xf32>, vector<16x32xf32>, vector<8x32xf32> -> vector<8x32xf32>
    %42 = arith.addf %38, %41 : vector<8x32xf32>
    %c0_37 = arith.constant 0 : index
    %c0_38 = arith.constant 0 : index
    %c0_39 = arith.constant 0 : index
    %43 = vector.load %arg11[%c0_37, %c0_38, %c0_39] : memref<3x1x32xf32, #tpu.memory_space<vmem>>, vector<1x1x32xf32>
    %44 = vector.shape_cast %43 : vector<1x1x32xf32> to vector<1x32xf32>
    %45 = vector.broadcast %44 : vector<1x32xf32> to vector<8x32xf32>
    %46 = arith.addf %42, %45 : vector<8x32xf32>
    %47 = arith.addf %46, %1 : vector<8x32xf32>
    %cst_40 = arith.constant 0.000000e+00 : f32
    %48 = vector.broadcast %cst_40 : f32 to vector<8x32xf32>
    %49 = arith.maximumf %47, %48 : vector<8x32xf32>
    %c1 = arith.constant 1 : index
    %c0_41 = arith.constant 0 : index
    %c0_42 = arith.constant 0 : index
    %50 = vector.load %arg4[%c1, %c0_41, %c0_42] : memref<3x32x48xf32, #tpu.memory_space<vmem>>, vector<1x32x48xf32>
    %51 = vector.shape_cast %50 : vector<1x32x48xf32> to vector<32x48xf32>
    %cst_43 = arith.constant dense<0.000000e+00> : vector<8x48xf32>
    %52 = tpu.matmul %49, %51, %cst_43 {dimension_numbers = #tpu.dot_dimension_numbers<[1], [0], [0], [1], [0, 0, 1, 1], [], []>} : vector<8x32xf32>, vector<32x48xf32>, vector<8x48xf32> -> vector<8x48xf32>
    %53 = vector.extract_strided_slice %52 {offsets = [0, 0], sizes = [8, 16], strides = [1, 1]} : vector<8x48xf32> to vector<8x16xf32>
    %c1_44 = arith.constant 1 : index
    %c0_45 = arith.constant 0 : index
    %c0_46 = arith.constant 0 : index
    %54 = vector.load %arg8[%c1_44, %c0_45, %c0_46] : memref<3x1x16xf32, #tpu.memory_space<vmem>>, vector<1x1x16xf32>
    %55 = vector.shape_cast %54 : vector<1x1x16xf32> to vector<1x16xf32>
    %56 = vector.broadcast %55 : vector<1x16xf32> to vector<8x16xf32>
    %57 = arith.addf %53, %56 : vector<8x16xf32>
    %cst_47 = arith.constant 0.000000e+00 : f32
    %58 = vector.broadcast %cst_47 : f32 to vector<8x16xf32>
    %59 = arith.maximumf %57, %58 : vector<8x16xf32>
    %60 = vector.extract_strided_slice %52 {offsets = [0, 16], sizes = [8, 16], strides = [1, 1]} : vector<8x48xf32> to vector<8x16xf32>
    %cst_48 = arith.constant dense<0.000000e+00> : vector<8x16xf32>
    %61 = tpu.matmul %3, %60, %cst_48 {dimension_numbers = #tpu.dot_dimension_numbers<[0], [0], [1], [1], [0, 1, 1, 1], [], []>} : vector<8x8xf32>, vector<8x16xf32>, vector<8x16xf32> -> vector<8x16xf32>
    %62 = vector.extract_strided_slice %52 {offsets = [0, 32], sizes = [8, 16], strides = [1, 1]} : vector<8x48xf32> to vector<8x16xf32>
    %cst_49 = arith.constant dense<0.000000e+00> : vector<8x16xf32>
    %63 = tpu.matmul %5, %62, %cst_49 {dimension_numbers = #tpu.dot_dimension_numbers<[0], [0], [1], [1], [0, 1, 1, 1], [], []>} : vector<8x8xf32>, vector<8x16xf32>, vector<8x16xf32> -> vector<8x16xf32>
    %c1_50 = arith.constant 1 : index
    %c0_51 = arith.constant 0 : index
    %c0_52 = arith.constant 0 : index
    %64 = vector.load %arg9[%c1_50, %c0_51, %c0_52] : memref<3x1x16xf32, #tpu.memory_space<vmem>>, vector<1x1x16xf32>
    %65 = vector.shape_cast %64 : vector<1x1x16xf32> to vector<1x16xf32>
    %66 = vector.broadcast %65 : vector<1x16xf32> to vector<8x16xf32>
    %67 = arith.addf %61, %66 : vector<8x16xf32>
    %cst_53 = arith.constant 0.000000e+00 : f32
    %68 = vector.broadcast %cst_53 : f32 to vector<8x16xf32>
    %69 = arith.maximumf %67, %68 : vector<8x16xf32>
    %c1_54 = arith.constant 1 : index
    %c0_55 = arith.constant 0 : index
    %c0_56 = arith.constant 0 : index
    %70 = vector.load %arg10[%c1_54, %c0_55, %c0_56] : memref<3x1x16xf32, #tpu.memory_space<vmem>>, vector<1x1x16xf32>
    %71 = vector.shape_cast %70 : vector<1x1x16xf32> to vector<1x16xf32>
    %72 = vector.broadcast %71 : vector<1x16xf32> to vector<8x16xf32>
    %73 = arith.addf %63, %72 : vector<8x16xf32>
    %cst_57 = arith.constant 0.000000e+00 : f32
    %74 = vector.broadcast %cst_57 : f32 to vector<8x16xf32>
    %75 = arith.maximumf %73, %74 : vector<8x16xf32>
    %c1_58 = arith.constant 1 : index
    %c0_59 = arith.constant 0 : index
    %c0_60 = arith.constant 0 : index
    %76 = vector.load %arg5[%c1_58, %c0_59, %c0_60] : memref<3x16x32xf32, #tpu.memory_space<vmem>>, vector<1x16x32xf32>
    %77 = vector.shape_cast %76 : vector<1x16x32xf32> to vector<16x32xf32>
    %cst_61 = arith.constant dense<0.000000e+00> : vector<8x32xf32>
    %78 = tpu.matmul %59, %77, %cst_61 {dimension_numbers = #tpu.dot_dimension_numbers<[1], [0], [0], [1], [0, 0, 1, 1], [], []>} : vector<8x16xf32>, vector<16x32xf32>, vector<8x32xf32> -> vector<8x32xf32>
    %c1_62 = arith.constant 1 : index
    %c0_63 = arith.constant 0 : index
    %c0_64 = arith.constant 0 : index
    %79 = vector.load %arg6[%c1_62, %c0_63, %c0_64] : memref<3x16x32xf32, #tpu.memory_space<vmem>>, vector<1x16x32xf32>
    %80 = vector.shape_cast %79 : vector<1x16x32xf32> to vector<16x32xf32>
    %cst_65 = arith.constant dense<0.000000e+00> : vector<8x32xf32>
    %81 = tpu.matmul %69, %80, %cst_65 {dimension_numbers = #tpu.dot_dimension_numbers<[1], [0], [0], [1], [0, 0, 1, 1], [], []>} : vector<8x16xf32>, vector<16x32xf32>, vector<8x32xf32> -> vector<8x32xf32>
    %82 = arith.addf %78, %81 : vector<8x32xf32>
    %c1_66 = arith.constant 1 : index
    %c0_67 = arith.constant 0 : index
    %c0_68 = arith.constant 0 : index
    %83 = vector.load %arg7[%c1_66, %c0_67, %c0_68] : memref<3x16x32xf32, #tpu.memory_space<vmem>>, vector<1x16x32xf32>
    %84 = vector.shape_cast %83 : vector<1x16x32xf32> to vector<16x32xf32>
    %cst_69 = arith.constant dense<0.000000e+00> : vector<8x32xf32>
    %85 = tpu.matmul %75, %84, %cst_69 {dimension_numbers = #tpu.dot_dimension_numbers<[1], [0], [0], [1], [0, 0, 1, 1], [], []>} : vector<8x16xf32>, vector<16x32xf32>, vector<8x32xf32> -> vector<8x32xf32>
    %86 = arith.addf %82, %85 : vector<8x32xf32>
    %c1_70 = arith.constant 1 : index
    %c0_71 = arith.constant 0 : index
    %c0_72 = arith.constant 0 : index
    %87 = vector.load %arg11[%c1_70, %c0_71, %c0_72] : memref<3x1x32xf32, #tpu.memory_space<vmem>>, vector<1x1x32xf32>
    %88 = vector.shape_cast %87 : vector<1x1x32xf32> to vector<1x32xf32>
    %89 = vector.broadcast %88 : vector<1x32xf32> to vector<8x32xf32>
    %90 = arith.addf %86, %89 : vector<8x32xf32>
    %91 = arith.addf %90, %49 : vector<8x32xf32>
    %cst_73 = arith.constant 0.000000e+00 : f32
    %92 = vector.broadcast %cst_73 : f32 to vector<8x32xf32>
    %93 = arith.maximumf %91, %92 : vector<8x32xf32>
    %c2 = arith.constant 2 : index
    %c0_74 = arith.constant 0 : index
    %c0_75 = arith.constant 0 : index
    %94 = vector.load %arg4[%c2, %c0_74, %c0_75] : memref<3x32x48xf32, #tpu.memory_space<vmem>>, vector<1x32x48xf32>
    %95 = vector.shape_cast %94 : vector<1x32x48xf32> to vector<32x48xf32>
    %cst_76 = arith.constant dense<0.000000e+00> : vector<8x48xf32>
    %96 = tpu.matmul %93, %95, %cst_76 {dimension_numbers = #tpu.dot_dimension_numbers<[1], [0], [0], [1], [0, 0, 1, 1], [], []>} : vector<8x32xf32>, vector<32x48xf32>, vector<8x48xf32> -> vector<8x48xf32>
    %97 = vector.extract_strided_slice %96 {offsets = [0, 0], sizes = [8, 16], strides = [1, 1]} : vector<8x48xf32> to vector<8x16xf32>
    %c2_77 = arith.constant 2 : index
    %c0_78 = arith.constant 0 : index
    %c0_79 = arith.constant 0 : index
    %98 = vector.load %arg8[%c2_77, %c0_78, %c0_79] : memref<3x1x16xf32, #tpu.memory_space<vmem>>, vector<1x1x16xf32>
    %99 = vector.shape_cast %98 : vector<1x1x16xf32> to vector<1x16xf32>
    %100 = vector.broadcast %99 : vector<1x16xf32> to vector<8x16xf32>
    %101 = arith.addf %97, %100 : vector<8x16xf32>
    %cst_80 = arith.constant 0.000000e+00 : f32
    %102 = vector.broadcast %cst_80 : f32 to vector<8x16xf32>
    %103 = arith.maximumf %101, %102 : vector<8x16xf32>
    %104 = vector.extract_strided_slice %96 {offsets = [0, 16], sizes = [8, 16], strides = [1, 1]} : vector<8x48xf32> to vector<8x16xf32>
    %cst_81 = arith.constant dense<0.000000e+00> : vector<8x16xf32>
    %105 = tpu.matmul %3, %104, %cst_81 {dimension_numbers = #tpu.dot_dimension_numbers<[0], [0], [1], [1], [0, 1, 1, 1], [], []>} : vector<8x8xf32>, vector<8x16xf32>, vector<8x16xf32> -> vector<8x16xf32>
    %106 = vector.extract_strided_slice %96 {offsets = [0, 32], sizes = [8, 16], strides = [1, 1]} : vector<8x48xf32> to vector<8x16xf32>
    %cst_82 = arith.constant dense<0.000000e+00> : vector<8x16xf32>
    %107 = tpu.matmul %5, %106, %cst_82 {dimension_numbers = #tpu.dot_dimension_numbers<[0], [0], [1], [1], [0, 1, 1, 1], [], []>} : vector<8x8xf32>, vector<8x16xf32>, vector<8x16xf32> -> vector<8x16xf32>
    %c2_83 = arith.constant 2 : index
    %c0_84 = arith.constant 0 : index
    %c0_85 = arith.constant 0 : index
    %108 = vector.load %arg9[%c2_83, %c0_84, %c0_85] : memref<3x1x16xf32, #tpu.memory_space<vmem>>, vector<1x1x16xf32>
    %109 = vector.shape_cast %108 : vector<1x1x16xf32> to vector<1x16xf32>
    %110 = vector.broadcast %109 : vector<1x16xf32> to vector<8x16xf32>
    %111 = arith.addf %105, %110 : vector<8x16xf32>
    %cst_86 = arith.constant 0.000000e+00 : f32
    %112 = vector.broadcast %cst_86 : f32 to vector<8x16xf32>
    %113 = arith.maximumf %111, %112 : vector<8x16xf32>
    %c2_87 = arith.constant 2 : index
    %c0_88 = arith.constant 0 : index
    %c0_89 = arith.constant 0 : index
    %114 = vector.load %arg10[%c2_87, %c0_88, %c0_89] : memref<3x1x16xf32, #tpu.memory_space<vmem>>, vector<1x1x16xf32>
    %115 = vector.shape_cast %114 : vector<1x1x16xf32> to vector<1x16xf32>
    %116 = vector.broadcast %115 : vector<1x16xf32> to vector<8x16xf32>
    %117 = arith.addf %107, %116 : vector<8x16xf32>
    %cst_90 = arith.constant 0.000000e+00 : f32
    %118 = vector.broadcast %cst_90 : f32 to vector<8x16xf32>
    %119 = arith.maximumf %117, %118 : vector<8x16xf32>
    %c2_91 = arith.constant 2 : index
    %c0_92 = arith.constant 0 : index
    %c0_93 = arith.constant 0 : index
    %120 = vector.load %arg5[%c2_91, %c0_92, %c0_93] : memref<3x16x32xf32, #tpu.memory_space<vmem>>, vector<1x16x32xf32>
    %121 = vector.shape_cast %120 : vector<1x16x32xf32> to vector<16x32xf32>
    %cst_94 = arith.constant dense<0.000000e+00> : vector<8x32xf32>
    %122 = tpu.matmul %103, %121, %cst_94 {dimension_numbers = #tpu.dot_dimension_numbers<[1], [0], [0], [1], [0, 0, 1, 1], [], []>} : vector<8x16xf32>, vector<16x32xf32>, vector<8x32xf32> -> vector<8x32xf32>
    %c2_95 = arith.constant 2 : index
    %c0_96 = arith.constant 0 : index
    %c0_97 = arith.constant 0 : index
    %123 = vector.load %arg6[%c2_95, %c0_96, %c0_97] : memref<3x16x32xf32, #tpu.memory_space<vmem>>, vector<1x16x32xf32>
    %124 = vector.shape_cast %123 : vector<1x16x32xf32> to vector<16x32xf32>
    %cst_98 = arith.constant dense<0.000000e+00> : vector<8x32xf32>
    %125 = tpu.matmul %113, %124, %cst_98 {dimension_numbers = #tpu.dot_dimension_numbers<[1], [0], [0], [1], [0, 0, 1, 1], [], []>} : vector<8x16xf32>, vector<16x32xf32>, vector<8x32xf32> -> vector<8x32xf32>
    %126 = arith.addf %122, %125 : vector<8x32xf32>
    %c2_99 = arith.constant 2 : index
    %c0_100 = arith.constant 0 : index
    %c0_101 = arith.constant 0 : index
    %127 = vector.load %arg7[%c2_99, %c0_100, %c0_101] : memref<3x16x32xf32, #tpu.memory_space<vmem>>, vector<1x16x32xf32>
    %128 = vector.shape_cast %127 : vector<1x16x32xf32> to vector<16x32xf32>
    %cst_102 = arith.constant dense<0.000000e+00> : vector<8x32xf32>
    %129 = tpu.matmul %119, %128, %cst_102 {dimension_numbers = #tpu.dot_dimension_numbers<[1], [0], [0], [1], [0, 0, 1, 1], [], []>} : vector<8x16xf32>, vector<16x32xf32>, vector<8x32xf32> -> vector<8x32xf32>
    %130 = arith.addf %126, %129 : vector<8x32xf32>
    %c2_103 = arith.constant 2 : index
    %c0_104 = arith.constant 0 : index
    %c0_105 = arith.constant 0 : index
    %131 = vector.load %arg11[%c2_103, %c0_104, %c0_105] : memref<3x1x32xf32, #tpu.memory_space<vmem>>, vector<1x1x32xf32>
    %132 = vector.shape_cast %131 : vector<1x1x32xf32> to vector<1x32xf32>
    %133 = vector.broadcast %132 : vector<1x32xf32> to vector<8x32xf32>
    %134 = arith.addf %130, %133 : vector<8x32xf32>
    %135 = arith.addf %134, %93 : vector<8x32xf32>
    %cst_106 = arith.constant 0.000000e+00 : f32
    %136 = vector.broadcast %cst_106 : f32 to vector<8x32xf32>
    %137 = arith.maximumf %135, %136 : vector<8x32xf32>
    %c0_107 = arith.constant 0 : index
    %c0_108 = arith.constant 0 : index
    %c0_109 = arith.constant 0 : index
    %138 = vector.load %arg12[%c0_107, %c0_108, %c0_109] : memref<1x8x32xf32, #tpu.memory_space<vmem>>, vector<1x8x32xf32>
    %139 = vector.shape_cast %138 : vector<1x8x32xf32> to vector<8x32xf32>
    %140 = vector.shape_cast %137 : vector<8x32xf32> to vector<1x8x32xf32>
    tpu.vector_store %arg12[%c0_107, %c0_108, %c0_109], %140 {strides = array<i32>} : memref<1x8x32xf32, #tpu.memory_space<vmem>>, vector<1x8x32xf32>,
    return
  }
  func.func @transform_0(%arg0: i32) -> (i32, i32, i32) {
    %c0_i32 = arith.constant 0 : i32
    %c0_i32_0 = arith.constant 0 : i32
    %c0_i32_1 = arith.constant 0 : i32
    return %arg0, %c0_i32, %c0_i32_0 : i32, i32, i32
  }
  func.func @transform_1(%arg0: i32) -> (i32, i32, i32) {
    %c0_i32 = arith.constant 0 : i32
    %c0_i32_0 = arith.constant 0 : i32
    %c0_i32_1 = arith.constant 0 : i32
    return %arg0, %c0_i32, %c0_i32_0 : i32, i32, i32
  }
  func.func @transform_2(%arg0: i32) -> (i32, i32, i32) {
    %c0_i32 = arith.constant 0 : i32
    %c0_i32_0 = arith.constant 0 : i32
    %c0_i32_1 = arith.constant 0 : i32
    return %arg0, %c0_i32, %c0_i32_0 : i32, i32, i32
  }
  func.func @transform_3(%arg0: i32) -> (i32, i32, i32) {
    %c0_i32 = arith.constant 0 : i32
    %c0_i32_0 = arith.constant 0 : i32
    %c0_i32_1 = arith.constant 0 : i32
    %c0_i32_2 = arith.constant 0 : i32
    return %c0_i32, %c0_i32_0, %c0_i32_1 : i32, i32, i32
  }
  func.func @transform_4(%arg0: i32) -> (i32, i32, i32) {
    %c0_i32 = arith.constant 0 : i32
    %c0_i32_0 = arith.constant 0 : i32
    %c0_i32_1 = arith.constant 0 : i32
    %c0_i32_2 = arith.constant 0 : i32
    return %c0_i32, %c0_i32_0, %c0_i32_1 : i32, i32, i32
  }
  func.func @transform_5(%arg0: i32) -> (i32, i32, i32) {
    %c0_i32 = arith.constant 0 : i32
    %c0_i32_0 = arith.constant 0 : i32
    %c0_i32_1 = arith.constant 0 : i32
    %c0_i32_2 = arith.constant 0 : i32
    return %c0_i32, %c0_i32_0, %c0_i32_1 : i32, i32, i32
  }
  func.func @transform_6(%arg0: i32) -> (i32, i32, i32) {
    %c0_i32 = arith.constant 0 : i32
    %c0_i32_0 = arith.constant 0 : i32
    %c0_i32_1 = arith.constant 0 : i32
    %c0_i32_2 = arith.constant 0 : i32
    return %c0_i32, %c0_i32_0, %c0_i32_1 : i32, i32, i32
  }
  func.func @transform_7(%arg0: i32) -> (i32, i32, i32) {
    %c0_i32 = arith.constant 0 : i32
    %c0_i32_0 = arith.constant 0 : i32
    %c0_i32_1 = arith.constant 0 : i32
    %c0_i32_2 = arith.constant 0 : i32
    return %c0_i32, %c0_i32_0, %c0_i32_1 : i32, i32, i32
  }
  func.func @transform_8(%arg0: i32) -> (i32, i32, i32) {
    %c0_i32 = arith.constant 0 : i32
    %c0_i32_0 = arith.constant 0 : i32
    %c0_i32_1 = arith.constant 0 : i32
    %c0_i32_2 = arith.constant 0 : i32
    return %c0_i32, %c0_i32_0, %c0_i32_1 : i32, i32, i32
  }
  func.func @transform_9(%arg0: i32) -> (i32, i32, i32) {
    %c0_i32 = arith.constant 0 : i32
    %c0_i32_0 = arith.constant 0 : i32
    %c0_i32_1 = arith.constant 0 : i32
    %c0_i32_2 = arith.constant 0 : i32
    return %c0_i32, %c0_i32_0, %c0_i32_1 : i32, i32, i32
  }
  func.func @transform_10(%arg0: i32) -> (i32, i32, i32) {
    %c0_i32 = arith.constant 0 : i32
    %c0_i32_0 = arith.constant 0 : i32
    %c0_i32_1 = arith.constant 0 : i32
    %c0_i32_2 = arith.constant 0 : i32
    return %c0_i32, %c0_i32_0, %c0_i32_1 : i32, i32, i32
  }
  func.func @transform_11(%arg0: i32) -> (i32, i32, i32) {
    %c0_i32 = arith.constant 0 : i32
    %c0_i32_0 = arith.constant 0 : i32
    %c0_i32_1 = arith.constant 0 : i32
    return %arg0, %c0_i32, %c0_i32_0 : i32, i32, i32
  }
}

</mosaic_0001>

<bundles_post_ra>
// kernel: tpu_custom_call.1
= control target key start
LH: loop header
LB: loop body
LE: loop exit
PB: predicated region body
PF: predicated region fallthrough
CT: control target
= control target key end

     0   :  { %s3493_s0 = inlined_call_operand.hbm [shape: f32[2,8,32], index: 0, kind: input, shape index: {}]   ;;  %s3494_s1 = inlined_call_operand.hbm [shape: f32[2,8,8], index: 1, kind: input, shape index: {}]   ;;  %s3495_s2 = inlined_call_operand.hbm [shape: f32[2,8,8], index: 2, kind: input, shape index: {}]   ;;  %s3496_s3 = inlined_call_operand.hbm [shape: f32[3,32,48], index: 3, kind: input, shape index: {}]   ;;  %s3497_s4 = inlined_call_operand.hbm [shape: f32[3,16,32], index: 4, kind: input, shape index: {}]   ;;  %s3498_s5 = inlined_call_operand.hbm [shape: f32[3,16,32], index: 5, kind: input, shape index: {}]   ;;  %s3499_s6 = inlined_call_operand.hbm [shape: f32[3,16,32], index: 6, kind: input, shape index: {}]   ;;  %s3500_s7 = inlined_call_operand.vmem [shape: f32[3,1,16], index: 7, kind: input, shape index: {}]   ;;  %s3501_s8 = inlined_call_operand.vmem [shape: f32[3,1,16], index: 8, kind: input, shape index: {}]   ;;  %s3502_s9 = inlined_call_operand.vmem [shape: f32[3,1,16], index: 9, kind: input, shape index: {}]   ;;  %s3503_s10 = inlined_call_operand.vmem [shape: f32[3,1,32], index: 10, kind: input, shape index: {}]   ;;  %s3504_s11 = inlined_call_operand.hbm [shape: f32[2,8,32], index: 11, kind: output, shape index: {}]  }
   0x1   :  { %3533 = sst [smem:[#allocation26_spill]] %s3494_s1 }
   0x2   :  { %3534 = sst [smem:[#allocation27_spill]] %s3496_s3 }
   0x3   :  { %3535 = sst [smem:[#allocation28_spill]] %s3498_s5 }
   0x4   :  { %3536 = sst [smem:[#allocation29_spill]] %s3501_s8 }
   0x5   :  { %3537 = sst [smem:[#allocation30_spill]] %s3502_s9 }
   0x6   :  { %3538 = sst [smem:[#allocation31_spill]] %s3503_s10 }
   0x7   :  { %3539 = sst [smem:[#allocation32_spill]] %s3504_s11 }
   0x8   :  { %16 = vsyncpa [#allocation3], 0 }
   0x9   :  { %18 = vsyncpa [#allocation3 + $0x1], 0 }
   0xa   :  { %19 = vsyncpa [#allocation6], 0 }
   0xb   :  { %21 = vsyncpa [#allocation6 + $0x1], 0 }
   0xc   :  { %22 = vsyncpa [#allocation9], 0 }
   0xd   :  { %23 = vsyncpa [#allocation12], 0 }
   0xe   :  { %24 = vsyncpa [#allocation4], 0 }
   0xf   :  { %26 = vsyncpa [#allocation4 + $0x1], 0  ;;  %s2994_s17 = smov 0   ;;  %s2996_s18 = smov 0  }
  0x10   :  { %s2998_s19 = smov 0   ;;  %s3000_s20 = smov 0  }
  0x11 LB: > { %3540 = sst [smem:[#allocation20_spill]] %s2905_s17  ;;  %s2919_s21 = smov [#allocation8]   ;;  %s2917_s20 = sphi %s3000_s20, %s3584_s20   ;;  %s2913_s19 = sphi %s2998_s19, %s3588_s19   ;;  %s2909_s18 = sphi %s2996_s18, %s3587_s18   ;;  %s2905_s17 = sphi %s2994_s17, %s3586_s17  }
  0x12   : > { %3541 = sst [smem:[#allocation21_spill]] %s2917_s20  ;;  %s321_s22 = sshll.u32 %s2919_s21, 4  ;;  %s3020_s22 = int_to_ptr.vmem [resolvable:$true] %s321_s22 }
  0x13   : > { %s3015_s23 = sadd.s32 4294967295, %s2917_s20   ;;  %p2245_p0 = scmp.ge.s32.totalorder %s2917_s20, 1 }
  0x14   : > { %p3518_p1 = scmp.eq.s32.totalorder %s3015_s23, 0  ;;  %p309_p2 = scmp.lt.s32.totalorder %s2917_s20, 3 }
  0x15   : > { %s2920_s25 = smov [#allocation11]   ;;  %s3544_s3 = sld [smem:[#allocation27_spill]] }
  0x16   : > { %p3022_p3 = pnand %p2245_p0, %p309_p2  ;;  %s347_s26 = sshll.u32 %s2920_s25, 4  ;;  %s3035_s26 = int_to_ptr.vmem [resolvable:$true] %s347_s26 }
  0x18   : > { %s3542_s24 = scalar_select %p3022_p3, 1, 0 }
  0x19   : > { %p2557_p5 = pneg %p3022_p3 }
  0x1b   : > { %p3031_p6 = pnand %p2557_p5, %p3518_p1  ;;  %s2637_s30 = scalar_lea.hbm %s3544_s3, 1536 }
  0x1c   : > { %p2638_p7 = scmp.ne.s32.totalorder %s3544_s3, %s2637_s30  ;;  %p2644_p11 = scmp.lt.u32.totalorder %s2637_s30, %s3544_s3 }
  0x1d   : > { %s3543_s27 = scalar_select %p3031_p6, 1, 0 }
  0x1e   : > { %p3045_p8 = pneg %p3031_p6 }
  0x20   : > { %s3545_s14 = scalar_select %p3045_p8, 1, 0 }
  0x21   : > { %p2640_p9 = pnand %p3045_p8, %p2638_p7 }
  0x23   : > { %p2641_p10 = pneg %p2640_p9 }
  0x25   : > { %p2646_p12 = pnand %p2644_p11, %p2641_p10 }
  0x27   : > { %2649 = shalt.err (!%p2646_p12)
}
  0x28   : > { %s2650_s21 = scalar_lea.vmem %s3020_s22, 1536  ;;  %p2658_p5 = scmp.lt.s32.totalorder %s3020_s22, %s3020_s22 }
  0x29   : > { %p2651_p13 = scmp.ne.s32.totalorder %s3020_s22, %s2650_s21  ;;  %p2659_p4 = scmp.lt.s32.totalorder %s2650_s21, %s2650_s21 }
  0x2b   : > { %p2653_p0 = pnand %p2651_p13, %p3045_p8  ;;  %p2660_p7 = por %p2659_p4, %p2658_p5 }
  0x2d   : > { %p2654_p2 = pneg %p2653_p0 }
  0x2f   : > { %p2661_p9 = pnand %p2660_p7, %p2654_p2 }
  0x31   : > { %2664 = shalt.err (!%p2661_p9)
}
  0x32   : > { %s3508_s25 = smov 128   ;;  %s3510_s28 = smov 8  }
  0x33   : > { %2560 = dma.hbm_to_vmem [thread:$0]  (!%p3031_p6), %s3544_s3, 1536, %s3020_s22, [#allocation9], %s3508_s25, %s3508_s25, %s3510_s28  }
  0x34   : > { %s3546_s5 = sld [smem:[#allocation28_spill]] }
  0x3a   : > { %s2665_s15 = scalar_lea.hbm %s3546_s5, 768 }
  0x3b   : > { %p2666_p4 = scmp.ne.s32.totalorder %s3546_s5, %s2665_s15  ;;  %p2672_p12 = scmp.lt.u32.totalorder %s2665_s15, %s3546_s5 }
  0x3d   : > { %p2668_p10 = pnand %p2666_p4, %p3045_p8 }
  0x3f   : > { %p2669_p11 = pneg %p2668_p10 }
  0x41   : > { %p2674_p13 = pnand %p2672_p12, %p2669_p11 }
  0x43   : > { %2677 = shalt.err (!%p2674_p13)
}
  0x44   : > { %s2678_s22 = scalar_lea.vmem %s3035_s26, 768  ;;  %p2686_p7 = scmp.lt.s32.totalorder %s3035_s26, %s3035_s26 }
  0x45   : > { %p2679_p0 = scmp.ne.s32.totalorder %s3035_s26, %s2678_s22  ;;  %p2687_p9 = scmp.lt.s32.totalorder %s2678_s22, %s2678_s22 }
  0x47   : > { %p2681_p2 = pnand %p2679_p0, %p3045_p8  ;;  %p2688_p4 = por %p2687_p9, %p2686_p7 }
  0x49   : > { %p2682_p5 = pneg %p2681_p2 }
  0x4b   : > { %p2689_p10 = pnand %p2688_p4, %p2682_p5 }
  0x4d   : > { %2692 = shalt.err (!%p2689_p10)
}
  0x4e   : > { %2566 = dma.hbm_to_vmem [thread:$0]  (!%p3031_p6), %s3546_s5, 768, %s3035_s26, [#allocation12], %s3508_s25, %s3508_s25, %s3510_s28  }
  0x4f   : > { %s2244_s29 = sadd.s32 4294967294, %s2917_s20   ;;  %s3097_s30 = sadd.s32 1, %s2917_s20  }
  0x50   : > { %3547 = sst [smem:[#allocation22_spill]] %s3097_s30  ;;  %s36_s12 = ssub.s32 %s2917_s20, %s3097_s30 }
  0x51   : > { %s39_s13 = sadd.s32 1, %s2913_s19  ;;  %p37_p11 = scmp.eq.s32.totalorder %s36_s12, 0 }
  0x52   : > { %p46_p12 = scmp.ne.s32.totalorder %s2913_s19, %s2909_s18  ;;  %p47_p13 = scmp.eq.s32.totalorder %s2917_s20, 0 }
  0x53   : > { %p52_p0 = scmp.ne.s32.totalorder %s2909_s18, %s2905_s17  ;;  %p296_p7 = scmp.eq.s32.totalorder %s3015_s23, 1 }
  0x54   : > { %s3108_s15 = scalar_select %p37_p11, %s2913_s19, %s39_s13  }
  0x55   : > { %p48_p2 = por %p47_p13, %p46_p12  ;;  %p3112_p5 = por %p3518_p1, %p52_p0 }
  0x56   : > { %3548 = sst [smem:[#allocation23_spill]] %s3108_s15  ;;  %p302_p9 = scmp.eq.s32.totalorder %s2244_s29, 1 }
  0x57   : > { %s3549_s16 = scalar_select %p3112_p5, 1, 0 }
  0x58   : > { %p2588_p4 = scmp.lt.s32.totalorder %s2917_s20, 2  ;;  %s3512_s26 = sand.u32 1, %s2913_s19  }
  0x59   : > { %p3119_p10 = por %p296_p7, %p46_p12  ;;  %p3123_p3 = por %p302_p9, %p52_p0 }
  0x5a   : > { %s3129_s10 = sshll.u32 %s3512_s26, 3  ;;  %s3132_s11 = sshll.u32 %s2917_s20, 7 }
  0x5b   : > { %s3550_s21 = scalar_select %p3119_p10, 1, 0 }
  0x5c   : > { %s3552_s22 = scalar_select %p3123_p3, 1, 0 }
  0x5d   : > { %3551 = sst [smem:[#allocation24_spill]] %s3550_s21  ;;  %p3134_p11 = pnand %p2588_p4, %p48_p2 }
  0x5e   : > { %3553 = sst [smem:[#allocation25_spill]] %s3552_s22  ;;  %s404_s29 = sand.u32 1, %s2917_s20  }
  0x5f   : > { %s3554_s12 = scalar_select %p3134_p11, 1, 0 }
  0x60   : > { %s3555_s1 = sld [smem:[#allocation26_spill]]  ;;  %s408_s26 = scalar_lea.vmem [#allocation5], %s3129_s10 }
  0x61   : > { %s415_s3 = sshll.u32 %s408_s26, 4  ;;  %s2923_s5 = smov [#allocation10]   ;;  %s3146_s3 = int_to_ptr.vmem [resolvable:$true] %s415_s3 }
  0x62   : > { %s3148_s15 = sshll.u32 %s2923_s5, 4  ;;  %s3150_s30 = scalar_lea.sflag [#allocation6], %s404_s29  ;;  %s335_s15 = int_to_ptr.vmem [resolvable:$true] %s3148_s15 }
  0x63   : > { %p3156_p13 = pneg %p3134_p11 }
  0x65   : > { %s3556_s25 = scalar_select %p3156_p13, 1, 0 }
  0x66   : > { %s3143_s28 = scalar_lea.hbm %s3555_s1, %s3132_s11  ;;  %s2698_s20 = scalar_lea.hbm %s3555_s1, 256 }
  0x67   : > { %s2693_s22 = scalar_lea.hbm %s3143_s28, 128  ;;  %p2699_p7 = scmp.lt.u32.totalorder %s3143_s28, %s3555_s1 }
  0x68   : > { %p2694_p12 = scmp.ne.s32.totalorder %s3143_s28, %s2693_s22  ;;  %p2700_p9 = scmp.lt.u32.totalorder %s2698_s20, %s2693_s22 }
  0x69   : > { %p2702_p1 = scmp.lt.u32.totalorder %s2693_s22, %s3143_s28 }
  0x6a   : > { %p2696_p0 = pnand %p3156_p13, %p2694_p12  ;;  %p2701_p4 = por %p2700_p9, %p2699_p7 }
  0x6c   : > { %p2697_p2 = pneg %p2696_p0  ;;  %p2703_p3 = por %p2702_p1, %p2701_p4 }
  0x6e   : > { %p2704_p10 = pnand %p2703_p3, %p2697_p2 }
  0x70   : > { %2707 = shalt.err (!%p2704_p10)
}
  0x71   : > { %s2708_s29 = scalar_lea.vmem %s3146_s3, 128  ;;  %s2924_s13 = smov [#allocation5]  }
  0x72   : > { %p2709_p12 = scmp.ne.s32.totalorder %s3146_s3, %s2708_s29  ;;  %s2713_s26 = sshll.u32 %s2924_s13, 4  ;;  %s2714_s26 = int_to_ptr.vmem [resolvable:$false] %s2713_s26 }
  0x73   : > { %s2715_s17 = scalar_lea.vmem %s2714_s26, 256  ;;  %p2716_p6 = scmp.lt.s32.totalorder %s3146_s3, %s2714_s26 }
  0x74   : > { %p2711_p0 = pnand %p2709_p12, %p3156_p13  ;;  %p2717_p8 = scmp.lt.s32.totalorder %s2715_s17, %s2708_s29 }
  0x76   : > { %p2712_p5 = pneg %p2711_p0  ;;  %p2718_p7 = por %p2717_p8, %p2716_p6 }
  0x78   : > { %p2719_p9 = pnand %p2718_p7, %p2712_p5 }
  0x7a   : > { %2722 = shalt.err (!%p2719_p9)
}
  0x7b   : > { %2576 = dma.hbm_to_vmem [thread:$0]  (!%p3134_p11), %s3143_s28, 128, %s3146_s3, %s3150_s30  }
  0x7c   : > { %s2723_s5 = scalar_lea.hbm %s3497_s4, 768  ;;  %p3557_p3 = scmp.ne.s32.totalorder %s3545_s14, 0 }
  0x7d   : > { %p2724_p1 = scmp.ne.s32.totalorder %s3497_s4, %s2723_s5  ;;  %p2730_p5 = scmp.lt.u32.totalorder %s2723_s5, %s3497_s4 }
  0x7f   : > { %p2726_p6 = pnand %p2724_p1, %p3557_p3 }
  0x81   : > { %p2727_p8 = pneg %p2726_p6 }
  0x83   : > { %p2732_p10 = pnand %p2730_p5, %p2727_p8 }
  0x85   : > { %2735 = shalt.err (!%p2732_p10)
}
  0x86   : > { %s2736_s17 = scalar_lea.vmem %s335_s15, 768  ;;  %p2744_p0 = scmp.lt.s32.totalorder %s335_s15, %s335_s15 }
  0x87   : > { %p2737_p2 = scmp.ne.s32.totalorder %s335_s15, %s2736_s17  ;;  %p2745_p7 = scmp.lt.s32.totalorder %s2736_s17, %s2736_s17 }
  0x89   : > { %p2739_p4 = pnand %p2737_p2, %p3557_p3  ;;  %p2746_p9 = por %p2745_p7, %p2744_p0 }
  0x8b   : > { %p2740_p12 = pneg %p2739_p4 }
  0x8d   : > { %p2747_p11 = pnand %p2746_p9, %p2740_p12 }
  0x8f   : > { %2750 = shalt.err (!%p2747_p11)
}
  0x90   : > { %p3558_p1 = scmp.ne.s32.totalorder %s3543_s27, 0  ;;  %s3559_s1 = smov 8  }
  0x91   : > { %s3560_s3 = smov 128   ;;  %s2925_s22 = smov [#allocation13]  }
  0x92   : > { %2563 = dma.hbm_to_vmem [thread:$0]  (!%p3558_p1), %s3497_s4, 768, %s335_s15, [#allocation9], %s3560_s3, %s3560_s3, %s3559_s1  }
  0x93   : > { %s360_s5 = sshll.u32 %s2925_s22, 4  ;;  %s2751_s26 = scalar_lea.hbm %s3499_s6, 768  ;;  %s361_s5 = int_to_ptr.vmem [resolvable:$true] %s360_s5 }
  0x94   : > { %p2752_p11 = scmp.ne.s32.totalorder %s3499_s6, %s2751_s26  ;;  %p2758_p5 = scmp.lt.u32.totalorder %s2751_s26, %s3499_s6 }
  0x96   : > { %p2754_p6 = pnand %p2752_p11, %p3557_p3 }
  0x98   : > { %p2755_p8 = pneg %p2754_p6 }
  0x9a   : > { %p2760_p10 = pnand %p2758_p5, %p2755_p8 }
  0x9c   : > { %2763 = shalt.err (!%p2760_p10)
}
  0x9d   : > { %s2764_s15 = scalar_lea.vmem %s361_s5, 768  ;;  %p2772_p0 = scmp.lt.s32.totalorder %s361_s5, %s361_s5 }
  0x9e   : > { %p2765_p2 = scmp.ne.s32.totalorder %s361_s5, %s2764_s15  ;;  %p2773_p7 = scmp.lt.s32.totalorder %s2764_s15, %s2764_s15 }
  0xa0   : > { %p2767_p4 = pnand %p2765_p2, %p3557_p3  ;;  %p2774_p9 = por %p2773_p7, %p2772_p0 }
  0xa2   : > { %p2768_p12 = pneg %p2767_p4 }
  0xa4   : > { %p2775_p13 = pnand %p2774_p9, %p2768_p12 }
  0xa6   : > { %2778 = shalt.err (!%p2775_p13)
}
  0xa7   : > { %2569 = dma.hbm_to_vmem [thread:$0]  (!%p3558_p1), %s3499_s6, 768, %s361_s5, [#allocation12], %s3560_s3, %s3560_s3, %s3559_s1  }
  0xa8   : > { %s3227_s28 = scalar_lea.hbm %s3493_s0, %s3132_s11  ;;  %s390_s27 = scalar_lea.vmem [#allocation2], %s3129_s10 }
  0xa9   : > { %s397_s20 = sshll.u32 %s390_s27, 4  ;;  %s3561_s22 = sand.u32 1, %s2913_s19   ;;  %s398_s20 = int_to_ptr.vmem [resolvable:$true] %s397_s20 }
  0xaa   : > { %s387_s13 = scalar_lea.sflag [#allocation3], %s3561_s22  ;;  %s2779_s29 = scalar_lea.hbm %s3227_s28, 128 }
  0xab   : > { %p2780_p13 = scmp.ne.s32.totalorder %s3227_s28, %s2779_s29  ;;  %p3562_p3 = scmp.ne.s32.totalorder %s3556_s25, 0 }
  0xac   : > { %s2784_s5 = scalar_lea.hbm %s3493_s0, 256  ;;  %p2785_p1 = scmp.lt.u32.totalorder %s3227_s28, %s3493_s0 }
  0xad   : > { %p2782_p11 = pnand %p2780_p13, %p3562_p3  ;;  %p2786_p8 = scmp.lt.u32.totalorder %s2784_s5, %s2779_s29 }
  0xae   : > { %p2788_p10 = scmp.lt.u32.totalorder %s2779_s29, %s3227_s28 }
  0xaf   : > { %p2783_p6 = pneg %p2782_p11  ;;  %p2787_p5 = por %p2786_p8, %p2785_p1 }
  0xb1   : > { %p2789_p2 = por %p2788_p10, %p2787_p5 }
  0xb3   : > { %p2790_p4 = pnand %p2789_p2, %p2783_p6 }
  0xb5   : > { %2793 = shalt.err (!%p2790_p4)
}
  0xb6   : > { %s2794_s15 = scalar_lea.vmem %s398_s20, 128  ;;  %s2926_s8 = smov [#allocation2]  }
  0xb7   : > { %p2795_p12 = scmp.ne.s32.totalorder %s398_s20, %s2794_s15  ;;  %s2799_s9 = sshll.u32 %s2926_s8, 4  ;;  %s2800_s9 = int_to_ptr.vmem [resolvable:$false] %s2799_s9 }
  0xb8   : > { %s2801_s14 = scalar_lea.vmem %s2800_s9, 256  ;;  %p2802_p9 = scmp.lt.s32.totalorder %s398_s20, %s2800_s9 }
  0xb9   : > { %p2797_p0 = pnand %p2795_p12, %p3562_p3  ;;  %p2803_p13 = scmp.lt.s32.totalorder %s2801_s14, %s2794_s15 }
  0xbb   : > { %p2798_p7 = pneg %p2797_p0  ;;  %p2804_p11 = por %p2803_p13, %p2802_p9 }
  0xbd   : > { %p2805_p1 = pnand %p2804_p11, %p2798_p7 }
  0xbf   : > { %2808 = shalt.err (!%p2805_p1)
}
  0xc0   : > { %p3563_p8 = scmp.ne.s32.totalorder %s3554_s12, 0  ;;  %s3253_s22 = scalar_lea.hbm %s3495_s2, %s3132_s11 }
  0xc1   : > { %s426_s29 = scalar_lea.vmem [#allocation7], %s3129_s10  ;;  %s2809_s3 = scalar_lea.hbm %s3253_s22, 128 }
  0xc2   : > { %2573 = dma.hbm_to_vmem [thread:$0]  (!%p3563_p8), %s3227_s28, 128, %s398_s20, %s387_s13  }
  0xc3   : > { %s433_s1 = sshll.u32 %s426_s29, 4  ;;  %p2810_p6 = scmp.ne.s32.totalorder %s3253_s22, %s2809_s3  ;;  %s434_s1 = int_to_ptr.vmem [resolvable:$true] %s433_s1 }
  0xc4   : > { %s2814_s28 = scalar_lea.hbm %s3495_s2, 256  ;;  %p2815_p2 = scmp.lt.u32.totalorder %s3253_s22, %s3495_s2 }
  0xc5   : > { %p2812_p5 = pnand %p2810_p6, %p3562_p3  ;;  %p2816_p4 = scmp.lt.u32.totalorder %s2814_s28, %s2809_s3 }
  0xc6   : > { %p2818_p0 = scmp.lt.u32.totalorder %s2809_s3, %s3253_s22 }
  0xc7   : > { %p2813_p10 = pneg %p2812_p5  ;;  %p2817_p12 = por %p2816_p4, %p2815_p2 }
  0xc9   : > { %p2819_p7 = por %p2818_p0, %p2817_p12 }
  0xcb   : > { %p2820_p9 = pnand %p2819_p7, %p2813_p10 }
  0xcd   : > { %2823 = shalt.err (!%p2820_p9)
}
  0xce   : > { %s2824_s10 = scalar_lea.vmem %s434_s1, 128  ;;  %s2927_s11 = smov [#allocation7]  }
  0xcf   : > { %p2825_p13 = scmp.ne.s32.totalorder %s434_s1, %s2824_s10  ;;  %s2829_s17 = sshll.u32 %s2927_s11, 4  ;;  %s2830_s17 = int_to_ptr.vmem [resolvable:$false] %s2829_s17 }
  0xd0   : > { %s2831_s15 = scalar_lea.vmem %s2830_s17, 256  ;;  %p2832_p6 = scmp.lt.s32.totalorder %s434_s1, %s2830_s17 }
  0xd1   : > { %p2827_p11 = pnand %p2825_p13, %p3562_p3  ;;  %p2833_p5 = scmp.lt.s32.totalorder %s2831_s15, %s2824_s10 }
  0xd3   : > { %p2828_p1 = pneg %p2827_p11  ;;  %p2834_p8 = por %p2833_p5, %p2832_p6 }
  0xd5   : > { %p2835_p2 = pnand %p2834_p8, %p2828_p1 }
  0xd7   : > { %2838 = shalt.err (!%p2835_p2)
}
  0xd8   : > { %p3564_p4 = scmp.ne.s32.totalorder %s3554_s12, 0  ;;  %p3565_p10 = scmp.ne.s32.totalorder %s3542_s24, 0 }
  0xd9   : > { %s3277_s25 = sand.u32 (!%p3565_p10), 1, %s2909_s18   ;;  %p3566_p3 = scmp.ne.s32.totalorder (!%p3565_p10), %s3549_s16, 0 }
  0xda   : > { %2579 = dma.hbm_to_vmem [thread:$0]  (!%p3564_p4), %s3253_s22, 128, %s434_s1, %s3150_s30  }
  0xdb   : > { %442 = sbr.rel (%p3565_p10) target bundleno = 2564 (0xa04), region = 64  ;;  %s3280_s8 = sshll.u32 (!%p3565_p10), %s3277_s25, 3 }
  0xdc   : > { %s445_s9 = scalar_lea.sflag (!%p3565_p10), [#allocation3], %s3277_s25  ;;  %s448_s14 = scalar_lea.vmem (!%p3565_p10), [#allocation2], %s3280_s8 }
  0xe2   : > { %2884 = dma.done.wait (%p3566_p3), %s445_s9, 128  }
  0xe3   : > { %2886 = vsyncadd (%p3566_p3), %s445_s9, 4294967168  ;;  %s453_s24 = sand.u32 1, %s3015_s23   ;;  %s457_s12 = scalar_lea.vmem [#allocation5], %s3280_s8 }
  0xe4   : > { %s454_s30 = scalar_lea.sflag [#allocation6], %s453_s24 }
  0xe5   : > { %2888 = dma.done.wait (%p3566_p3), %s454_s30, 256  }
  0xe6   : > { %2890 = vsyncadd (%p3566_p3), %s454_s30, 4294967040  ;;  %s466_s21 = scalar_lea.vmem [#allocation7], %s3280_s8  ;;  %p3567_p8 = scmp.eq.s32.totalorder %s3015_s23, 0 }
  0xe8   : > { %2892 = dma.done.wait (%p3567_p8), [#allocation9], 2304   ;;  %p3568_p12 = pmov %p3567_p8 }
  0xe9   : > { %p3569_p0 = pmov %p3567_p8 }
  0xea   : > { %2894 = vsyncadd (%p3568_p12), [#allocation9], 4294964992 }
  0xeb   : > { %2896 = dma.done.wait (%p3569_p0), [#allocation12], 1536   ;;  %p3570_p7 = pmov %p3569_p0 }
  0xec   : > { %v2928_v0 = vmov 0.0|0.0   ;;  %vm2929_vm0 = vmmov 0   ;;  %v2930_v1 = vmov 0.0   ;;  %v534_v2 = vld [vmem:[#allocation8] sm:$0xff]  ;;  %v535_v3 = vld [vmem:[#allocation8 + $0x8] sm:$0xff]  ;;  %v536_v4 = vld [vmem:[#allocation8 + $0x10] sm:$0xff] }
  0xed   : > { %2898 = vsyncadd (%p3570_p7), [#allocation12], 4294965760  ;;  %2488 = vmatprep.subr.bf16.mxu0 %v2928_v0  ;;  %2370 = vmatprep.mubr.msk.f32.mxu0 %vm2929_vm0, %v2930_v1  ;;  %v2489_v5 = vpack.c.bf16 %v535_v3, %v534_v2  ;;  %v537_v6 = vld [vmem:[#allocation8 + $0x18] sm:$0xff]  ;;  %v532_v7 = vld [vmem:[%s457_s12] sm:$0xff]  ;;  %vm538_vm1 = vcmask 261120   ;;  %s2931_s22 = smov 112  }
  0xee   : > { %2373 = vmatprep.subr.mxu1 %v2930_v1  ;;  %2375 = vmatprep.mubr.msk.f32.mxu1 %vm2929_vm0, %v2930_v1  ;;  %v2492_v8 = vpack.c.bf16 %v537_v6, %v536_v4  ;;  %v533_v9 = vld [vmem:[%s466_s21] sm:$0xff]  ;;  %v855_v11 = vld [vmem:[#allocation10] sm:$0xff]  ;;  %v856_v12 = vld [vmem:[#allocation10 + $0x8] sm:$0xff]  ;;  %vm859_vm2 = vcmask 130048   ;;  %s2932_s29 = smov 96   ;;  %vm664_vm3 = vcmask 64512  }
  0xef   : > { %628 = vxpose.xlu1.b32.start.end [1/1] (short) (narrow) %v532_v7, 8  ;;  %2490 = vmatpush3.bf16.msra.mxu0 %v2489_v5  ;;  %v3312_v10 = vld [vmem:[%s448_s14] sm:$0xff]  ;;  %v2498_v13 = vpack.c.bf16 %v856_v12, %v855_v11  ;;  %s3571_s5 = sld [smem:[#allocation29_spill]]  ;;  %v1006_v29 = vld [vmem:[#allocation13] sm:$0xff]  ;;  %v1007_v30 = vld [vmem:[#allocation13 + $0x8] sm:$0xff]  ;;  %s3572_s20 = sld [smem:[#allocation30_spill]] }
  0xf0   : > { %2491 = vmatprep.subr.bf16.mxu0 %v2928_v0  ;;  %v2267_v14 = vld [vmem:[%s3500_s7] ss:$0 sm:$0xff]  ;;  %v858_v24 = vld [vmem:[#allocation11 + $0x8] sm:$0xff]  ;;  %v2501_v35 = vpack.c.bf16 %v1007_v30, %v1006_v29  ;;  %v1093_v41 = vld [vmem:[#allocation8 + $0x20] sm:$0xff]  ;;  %s3574_s17 = sld [smem:[#allocation31_spill]]  ;;  %s3576_s11 = sld [smem:[#allocation24_spill]] }
  0xf1   : > { %v857_v23 = vld [vmem:[#allocation11] sm:$0xff]  ;;  %v1094_v42 = vld [vmem:[#allocation8 + $0x28] sm:$0xff]  ;;  %v1096_v45 = vld [vmem:[#allocation8 + $0x38] sm:$0xff]  ;;  %s530_s9 = scalar_lea.vmem [#allocation14], %s3280_s8  ;;  %s3577_s12 = sld [smem:[#allocation32_spill]] }
  0xf2   : > { %v2495_v25 = vpack.c.bf16 %v858_v24, %v857_v23  ;;  %v2504_v43 = vpack.c.bf16 %v1094_v42, %v1093_v41  ;;  %v1095_v44 = vld [vmem:[#allocation8 + $0x30] sm:$0xff]  ;;  %v1347_v61 = vld [vmem:[#allocation10 + $0x18] sm:$0xff]  ;;  %v1349_v5 = vld [vmem:[#allocation11 + $0x10] sm:$0xff]  ;;  %s2093_s14 = sshll.u32 %s530_s9, 4  ;;  %s2080_s16 = scalar_lea.sflag [#allocation4], %s3277_s25  ;;  %s3450_s14 = int_to_ptr.vmem [resolvable:$true] %s2093_s14 }
  0xf3   : > { %746 = vxpose.xlu1.b32.start.end [1/1] (short) (narrow) %v533_v9, 8  ;;  %2493 = vmatpush3.bf16.msra.mxu0 %v2492_v8  ;;  %v2507_v46 = vpack.c.bf16 %v1096_v45, %v1095_v44  ;;  %v1346_v60 = vld [vmem:[#allocation10 + $0x10] sm:$0xff]  ;;  %v1350_v6 = vld [vmem:[#allocation11 + $0x18] sm:$0xff]  ;;  %v1589_v29 = vld [vmem:[#allocation8 + $0x58] sm:$0xff]  ;;  %s2839_s27 = scalar_lea.vmem %s3450_s14, 128 }
  0xf4   : > { %2497 = vmatprep.subr.bf16.mxu0 %v2928_v0  ;;  %v2278_v62 = vld [vmem:[%s3500_s7 + $0x1] ss:$0 sm:$0xff]  ;;  %v2513_v2 = vpack.c.bf16 %v1347_v61, %v1346_v60  ;;  %v2510_v7 = vpack.c.bf16 %v1350_v6, %v1349_v5  ;;  %v1839_v44 = vld [vmem:[#allocation10 + $0x20] sm:$0xff]  ;;  %v1840_v45 = vld [vmem:[#allocation10 + $0x28] sm:$0xff]  ;;  %p2840_p9 = scmp.ne.s32.totalorder %s3450_s14, %s2839_s27 }
  0xf5   : > { %v2268_v28 = vld [vmem:[%s3571_s5] ss:$0 sm:$0xff]  ;;  %s3573_s13 = smov %s3572_s20  ;;  %v2280_v8 = vld [vmem:[%s3571_s5 + $0x1] ss:$0 sm:$0xff] }
  0xf6   : > { %2371 = vmatmul.mubr.msk.f32.vlgmr.msra.gmra.mrb[0].mxu0 %vm538_vm1, %v3312_v10  ;;  %v2270_v34 = vld [vmem:[%s3572_s20] ss:$0 sm:$0xff]  ;;  %s3575_s15 = smov %s3574_s17  ;;  %p3578_p13 = scmp.ne.s32.totalorder %s3576_s11, 0 }
  0xf7   : > { %2394 = vmatprep.mubr.msk.f32.mxu0 %vm2929_vm0, %v2930_v1  ;;  %2499 = vmatpush3.bf16.msra.mxu0 %v2498_v13  ;;  %v2275_v51 = vld [vmem:[%s3574_s17] ss:$0 sm:$0xff]  ;;  %s2305_s17 = sshll.u32 %s3015_s23, 7  ;;  %s2933_s23 = smov [#allocation14]  }
  0xf8   : > { %2503 = vmatprep.subr.bf16.mxu0 %v2928_v0  ;;  %v1498_v9 = vld [vmem:[#allocation13 + $0x10] sm:$0xff]  ;;  %s3448_s21 = scalar_lea.hbm %s3577_s12, %s2305_s17  ;;  %p2841_p11 = pnand %p2840_p9, %p3578_p13 }
  0xf9   : > { %s2843_s8 = sshll.u32 %s2933_s23, 4  ;;  %s2844_s8 = int_to_ptr.vmem [resolvable:$false] %s2843_s8 }
  0xfa   : > { %p2842_p1 = pneg %p2841_p11  ;;  %s2845_s1 = scalar_lea.vmem %s2844_s8, 256 }
  0xfb   : > { %p2846_p6 = scmp.lt.s32.totalorder %s3450_s14, %s2844_s8  ;;  %p2847_p5 = scmp.lt.s32.totalorder %s2845_s1, %s2839_s27 }
  0xfd   : > { %p2848_p2 = por %p2847_p5, %p2846_p6 }
  0xff   : > { %p2849_p4 = pnand %p2848_p2, %p2842_p1 }
 0x16f   : > { %v3328_v19 = vpop.trf.xlu1 }
 0x173   : > { %v3333_v21 = vpop.trf.xlu1 }
 0x1c9   : > { %v608_v15 = vpop.f32.mrb[0].mxu0 }
 0x1ca   : > { %v619_v16 = vadd.f32 %v2267_v14, %v608_v15  ;;  %661 = vrot.lane.b32.xlu0 %v608_v15, %s2931_s22  ;;  %v2372_v17 = vpop.f32.mrb[1].mxu0  ;;  %v2283_v14 = vld [vmem:[%s3573_s13 + $0x1] ss:$0 sm:$0xff] }
 0x1cc   : > { %v620_v18 = vmax.f32 %v619_v16, 0.0 }
 0x1ce   : > { %778 = vrot.lane.b32.xlu0 %v608_v15, %s2932_s29  ;;  %2395 = vmatmul.mubr.msk.f32.vlgmr.msra.gmra.mrb[2].mxu0 %vm859_vm2, %v620_v18 }
 0x1cf   : > { %2412 = vmatprep.mubr.msk.f32.mxu0 %vm2929_vm0, %v2930_v1  ;;  %2505 = vmatpush3.bf16.msra.mxu0 %v2504_v43 }
 0x1d0   : > { %2506 = vmatprep.subr.bf16.mxu0 %v2928_v0 }
 0x1d3   : > { %2508 = vmatpush3.bf16.msra.mxu0 %v2507_v46  ;;  %v2292_v46 = vld [vmem:[%s3500_s7 + $0x2] ss:$0 sm:$0xff] }
 0x1d4   : > { %2509 = vmatprep.subr.bf16.mxu0 %v2928_v0 }
 0x23c   : > { %v662_v20 = vpop.permute.xlu0 %661 }
 0x23d   : > { %2374 = vmatpush3.msra.mxu1 %v662_v20 }
 0x23e   : > { %2376 = vmatmul.mubr.msk.f32.vlgmr.msra.gmra.mrb[0].mxu1 %vm664_vm3, %v3328_v19  ;;  %2378 = vmatprep.subr.mxu1 %v2930_v1 }
 0x23f   : > { %2380 = vmatprep.mubr.msk.f32.mxu1 %vm2929_vm0, %v2930_v1 }
 0x240   : > { %v779_v22 = vpop.permute.xlu0 %778 }
 0x241   : > { %2379 = vmatpush3.msra.mxu1 %v779_v22 }
 0x242   : > { %2381 = vmatmul.mubr.msk.f32.vlgmr.msra.gmra.mrb[2].mxu1 %vm664_vm3, %v3333_v21  ;;  %2494 = vmatprep.subr.bf16.mxu1 %v2928_v0 }
 0x243   : > { %2387 = vmatprep.mubr.msk.f32.mxu1 %vm2929_vm0, %v2930_v1  ;;  %2496 = vmatpush3.bf16.msra.mxu1 %v2495_v25  ;;  %v1586_v25 = vld [vmem:[#allocation8 + $0x40] sm:$0xff] }
 0x244   : > { %2500 = vmatprep.subr.bf16.mxu1 %v2928_v0 }
 0x2a1   : > { %v1002_v26 = vpop.f32.mrb[2].mxu0 }
 0x2a2   : > { %v2396_v27 = vpop.f32.mrb[3].mxu0 }
 0x311   : > { %v734_v31 = vpop.f32.mrb[0].mxu1 }
 0x312   : > { %v735_v32 = vadd.f32 %v2268_v28, %v734_v31  ;;  %v2377_v33 = vpop.f32.mrb[1].mxu1  ;;  %v1588_v28 = vld [vmem:[#allocation8 + $0x50] sm:$0xff] }
 0x313   : > { %v2522_v30 = vpack.c.bf16 %v1589_v29, %v1588_v28 }
 0x314   : > { %v738_v36 = vmax.f32 %v735_v32, 0.0 }
 0x315   : > { %v850_v37 = vpop.f32.mrb[2].mxu1 }
 0x316   : > { %v851_v38 = vadd.f32 %v2270_v34, %v850_v37  ;;  %v2382_v39 = vpop.f32.mrb[3].mxu1  ;;  %2388 = vmatmul.mubr.msk.f32.vlgmr.msra.gmra.mrb[4].mxu1 %vm859_vm2, %v738_v36 }
 0x317   : > { %2502 = vmatpush3.bf16.msra.mxu1 %v2501_v35  ;;  %2401 = vmatprep.mubr.msk.f32.mxu1 %vm2929_vm0, %v2930_v1  ;;  %v2289_v35 = vld [vmem:[%s3575_s15 + $0x1] ss:$0 sm:$0xff] }
 0x318   : > { %v854_v40 = vmax.f32 %v851_v38, 0.0  ;;  %2415 = vmatprep.subr.mxu1 %v2930_v1 }
 0x31a   : > { %2402 = vmatmul.mubr.msk.f32.vlgmr.msra.gmra.mrb[6].mxu1 %vm859_vm2, %v854_v40 }
 0x31b   : > { %2417 = vmatprep.mubr.msk.f32.mxu1 %vm2929_vm0, %v2930_v1 }
 0x3e9   : > { %v929_v47 = vpop.f32.mrb[4].mxu1 }
 0x3ea   : > { %v1003_v48 = vadd.f32 %v1002_v26, %v929_v47  ;;  %v2389_v49 = vpop.f32.mrb[5].mxu1  ;;  %v1587_v26 = vld [vmem:[#allocation8 + $0x48] sm:$0xff]  ;;  %v2528_v47 = vpack.c.bf16 %v1840_v45, %v1839_v44 }
 0x3eb   : > { %v2519_v27 = vpack.c.bf16 %v1587_v26, %v1586_v25 }
 0x3ed   : > { %v1077_v50 = vpop.f32.mrb[6].mxu1 }
 0x3ee   : > { %v1081_v52 = vadd.f32 %v1077_v50, %v1003_v48  ;;  %v2403_v53 = vpop.f32.mrb[7].mxu1 }
 0x3ef   : > { %v2294_v53 = vld [vmem:[%s3571_s5 + $0x2] ss:$0 sm:$0xff] }
 0x3f0   : > { %v1089_v54 = vadd.f32 %v2275_v51, %v1081_v52  ;;  %v1843_v51 = vld [vmem:[#allocation11 + $0x28] sm:$0xff] }
 0x3f2   : > { %v3362_v55 = vadd.f32 %v1089_v54, %v3312_v10  ;;  %v1499_v10 = vld [vmem:[#allocation13 + $0x18] sm:$0xff]  ;;  %v1992_v54 = vld [vmem:[#allocation13 + $0x28] sm:$0xff] }
 0x3f3   : > { %v2516_v15 = vpack.c.bf16 %v1499_v10, %v1498_v9 }
 0x3f4   : > { %v1091_v56 = vmax.f32 %v3362_v55, 0.0 }
 0x3f6   : > { %2413 = vmatmul.mubr.msk.f32.vlgmr.msra.gmra.mrb[4].mxu0 %vm538_vm1, %v1091_v56 }
 0x3f7   : > { %2429 = vmatprep.mubr.msk.f32.mxu0 %vm2929_vm0, %v2930_v1  ;;  %2511 = vmatpush3.bf16.msra.mxu0 %v2510_v7 }
 0x3f8   : > { %2515 = vmatprep.subr.bf16.mxu0 %v2928_v0 }
 0x4c9   : > { %v1166_v57 = vpop.f32.mrb[4].mxu0 }
 0x4ca   : > { %1271 = vrot.lane.b32.xlu1 %v1166_v57, %s2932_s29  ;;  %1189 = vrot.lane.b32.xlu0 %v1166_v57, %s2931_s22  ;;  %v2414_v58 = vpop.f32.mrb[5].mxu0  ;;  %v1178_v3 = vadd.f32 %v2278_v62, %v1166_v57 }
 0x4cb   : > { %v2297_v58 = vld [vmem:[%s3573_s13 + $0x2] ss:$0 sm:$0xff] }
 0x4cc   : > { %v1179_v4 = vmax.f32 %v1178_v3, 0.0 }
 0x53c   : > { %v1190_v59 = vpop.permute.xlu0 %1189  ;;  %v1272_v63 = vpop.permute.xlu1 %1271 }
 0x53d   : > { %2416 = vmatpush3.msra.mxu1 %v1190_v59 }
 0x53e   : > { %2418 = vmatmul.mubr.msk.f32.vlgmr.msra.gmra.mrb[8].mxu1 %vm664_vm3, %v3328_v19  ;;  %2420 = vmatprep.subr.mxu1 %v2930_v1 }
 0x53f   : > { %2421 = vmatpush3.msra.mxu1 %v1272_v63  ;;  %2422 = vmatprep.mubr.msk.f32.mxu1 %vm2929_vm0, %v2930_v1 }
 0x540   : > { %2512 = vmatprep.subr.bf16.mxu1 %v2928_v0 }
 0x542   : > { %2423 = vmatmul.mubr.msk.f32.vlgmr.msra.gmra.mrb[10].mxu1 %vm664_vm3, %v3333_v21 }
 0x543   : > { %2514 = vmatpush3.bf16.msra.mxu1 %v2513_v2  ;;  %2436 = vmatprep.mubr.msk.f32.mxu1 %vm2929_vm0, %v2930_v1 }
 0x544   : > { %2518 = vmatprep.subr.bf16.mxu1 %v2928_v0 }
 0x546   : > { %2437 = vmatmul.mubr.msk.f32.vlgmr.msra.gmra.mrb[12].mxu1 %vm859_vm2, %v1179_v4 }
 0x547   : > { %2454 = vmatprep.mubr.msk.f32.mxu1 %vm2929_vm0, %v2930_v1  ;;  %2520 = vmatpush3.bf16.msra.mxu1 %v2519_v27 }
 0x548   : > { %2521 = vmatprep.subr.bf16.mxu1 %v2928_v0 }
 0x54b   : > { %2523 = vmatpush3.bf16.msra.mxu1 %v2522_v30 }
 0x54c   : > { %2524 = vmatprep.subr.bf16.mxu1 %v2928_v0 }
 0x611   : > { %v1258_v11 = vpop.f32.mrb[8].mxu1 }
 0x612   : > { %v1259_v12 = vadd.f32 %v2280_v8, %v1258_v11  ;;  %v2419_v13 = vpop.f32.mrb[9].mxu1  ;;  %v2303_v8 = vld [vmem:[%s3575_s15 + $0x2] ss:$0 sm:$0xff] }
 0x614   : > { %v1262_v16 = vmax.f32 %v1259_v12, 0.0 }
 0x615   : > { %v1340_v17 = vpop.f32.mrb[10].mxu1 }
 0x616   : > { %v1341_v18 = vadd.f32 %v2283_v14, %v1340_v17  ;;  %v2424_v20 = vpop.f32.mrb[11].mxu1  ;;  %2430 = vmatmul.mubr.msk.f32.vlgmr.msra.gmra.mrb[6].mxu0 %vm859_vm2, %v1262_v16 }
 0x617   : > { %2517 = vmatpush3.bf16.msra.mxu0 %v2516_v15  ;;  %2443 = vmatprep.mubr.msk.f32.mxu0 %vm2929_vm0, %v2930_v1 }
 0x618   : > { %v1344_v22 = vmax.f32 %v1341_v18, 0.0  ;;  %2457 = vmatprep.subr.mxu0 %v2930_v1 }
 0x619   : > { %v1493_v23 = vpop.f32.mrb[12].mxu1 }
 0x61a   : > { %v2438_v24 = vpop.f32.mrb[13].mxu1  ;;  %2444 = vmatmul.mubr.msk.f32.vlgmr.msra.gmra.mrb[8].mxu0 %vm859_vm2, %v1344_v22 }
 0x61b   : > { %2459 = vmatprep.mubr.msk.f32.mxu0 %vm2929_vm0, %v2930_v1 }
 0x6e9   : > { %v1420_v31 = vpop.f32.mrb[6].mxu0 }
 0x6ea   : > { %v1494_v32 = vadd.f32 %v1493_v23, %v1420_v31  ;;  %v2431_v33 = vpop.f32.mrb[7].mxu0 }
 0x6ed   : > { %v1569_v34 = vpop.f32.mrb[8].mxu0 }
 0x6ee   : > { %v1573_v36 = vadd.f32 %v1569_v34, %v1494_v32  ;;  %v2445_v37 = vpop.f32.mrb[9].mxu0 }
 0x6f0   : > { %v1582_v38 = vadd.f32 %v2289_v35, %v1573_v36 }
 0x6f2   : > { %v1583_v39 = vadd.f32 %v1582_v38, %v1091_v56 }
 0x6f4   : > { %v1584_v40 = vmax.f32 %v1583_v39, 0.0 }
 0x6f6   : > { %2455 = vmatmul.mubr.msk.f32.vlgmr.msra.gmra.mrb[14].mxu1 %vm538_vm1, %v1584_v40 }
 0x6f7   : > { %2471 = vmatprep.mubr.msk.f32.mxu1 %vm2929_vm0, %v2930_v1 }
 0x7c9   : > { %v1659_v41 = vpop.f32.mrb[14].mxu1 }
 0x7ca   : > { %1682 = vrot.lane.b32.xlu0 %v1659_v41, %s2931_s22  ;;  %v2456_v42 = vpop.f32.mrb[15].mxu1  ;;  %v1671_v48 = vadd.f32 %v2292_v46, %v1659_v41 }
 0x7cc   : > { %v1672_v50 = vmax.f32 %v1671_v48, 0.0 }
 0x7ce   : > { %1764 = vrot.lane.b32.xlu0 %v1659_v41, %s2932_s29 }
 0x83c   : > { %v1683_v43 = vpop.permute.xlu0 %1682 }
 0x83d   : > { %2458 = vmatpush3.msra.mxu0 %v1683_v43 }
 0x83e   : > { %2460 = vmatmul.mubr.msk.f32.vlgmr.msra.gmra.mrb[10].mxu0 %vm664_vm3, %v3328_v19  ;;  %2462 = vmatprep.subr.mxu0 %v2930_v1  ;;  %v1842_v19 = vld [vmem:[#allocation11 + $0x20] sm:$0xff] }
 0x83f   : > { %2464 = vmatprep.mubr.msk.f32.mxu0 %vm2929_vm0, %v2930_v1  ;;  %v2525_v52 = vpack.c.bf16 %v1843_v51, %v1842_v19 }
 0x840   : > { %v1765_v49 = vpop.permute.xlu0 %1764 }
 0x841   : > { %2463 = vmatpush3.msra.mxu0 %v1765_v49  ;;  %2526 = vmatpush3.bf16.msra.mxu1 %v2525_v52 }
 0x842   : > { %2465 = vmatmul.mubr.msk.f32.vlgmr.msra.gmra.mrb[12].mxu0 %vm664_vm3, %v3333_v21  ;;  %2527 = vmatprep.subr.bf16.mxu0 %v2928_v0  ;;  %v1991_v21 = vld [vmem:[#allocation13 + $0x20] sm:$0xff] }
 0x843   : > { %2529 = vmatpush3.bf16.msra.mxu0 %v2528_v47  ;;  %2478 = vmatprep.mubr.msk.f32.mxu0 %vm2929_vm0, %v2930_v1  ;;  %v2531_v59 = vpack.c.bf16 %v1992_v54, %v1991_v21 }
 0x844   : > { %2530 = vmatprep.subr.bf16.mxu1 %v2928_v0 }
 0x846   : > { %2479 = vmatmul.mubr.msk.f32.vlgmr.msra.gmra.mrb[14].mxu0 %vm859_vm2, %v1672_v50 }
 0x911   : > { %v1751_v55 = vpop.f32.mrb[10].mxu0 }
 0x912   : > { %v1752_v56 = vadd.f32 %v2294_v53, %v1751_v55  ;;  %v2461_v57 = vpop.f32.mrb[11].mxu0 }
 0x914   : > { %v1755_v60 = vmax.f32 %v1752_v56, 0.0 }
 0x915   : > { %v1833_v61 = vpop.f32.mrb[12].mxu0 }
 0x916   : > { %v1834_v62 = vadd.f32 %v2297_v58, %v1833_v61  ;;  %v2466_v63 = vpop.f32.mrb[13].mxu0  ;;  %2472 = vmatmul.mubr.msk.f32.vlgmr.msra.gmra.mrb[16].mxu1 %vm859_vm2, %v1755_v60 }
 0x917   : > { %2532 = vmatpush3.bf16.msra.mxu1 %v2531_v59  ;;  %2485 = vmatprep.mubr.msk.f32.mxu1 %vm2929_vm0, %v2930_v1 }
 0x918   : > { %v1837_v0 = vmax.f32 %v1834_v62, 0.0 }
 0x919   : > { %v1986_v2 = vpop.f32.mrb[14].mxu0 }
 0x91a   : > { %v2480_v3 = vpop.f32.mrb[15].mxu0  ;;  %2486 = vmatmul.mubr.msk.f32.vlgmr.msra.gmra.mrb[18].mxu1 %vm859_vm2, %v1837_v0 }
 0x9e9   : > { %v1913_v4 = vpop.f32.mrb[16].mxu1 }
 0x9ea   : > { %v1987_v5 = vadd.f32 %v1986_v2, %v1913_v4  ;;  %v2473_v6 = vpop.f32.mrb[17].mxu1 }
 0x9ed   : > { %v2062_v7 = vpop.f32.mrb[18].mxu1 }
 0x9ee   : > { %v2066_v9 = vadd.f32 %v2062_v7, %v1987_v5  ;;  %v2487_v10 = vpop.f32.mrb[19].mxu1 }
 0x9f0   : > { %v2075_v11 = vadd.f32 %v2303_v8, %v2066_v9 }
 0x9f2   : > { %v2076_v1 = vadd.f32 %v2075_v11, %v1584_v40 }
 0x9f4   : > { %v2077_v12 = vmax.f32 %v2076_v1, 0.0 }
 0x9f6   : > { %2078 = vst.msk [vmem:[%s530_s9] sm:$0xff] %vm538_vm1, %v2077_v12 }
 0x9f7   : > { %2852 = shalt.err (!%p2849_p4)
}
 0x9f8   : > { %s2853_s25 = scalar_lea.hbm %s3448_s21, 128  ;;  %s2857_s29 = scalar_lea.hbm %s3577_s12, 256 }
 0x9f9   : > { %p2854_p10 = scmp.ne.s32.totalorder %s3448_s21, %s2853_s25  ;;  %p2858_p12 = scmp.lt.u32.totalorder %s3448_s21, %s3577_s12 }
 0x9fa   : > { %p2859_p0 = scmp.lt.u32.totalorder %s2857_s29, %s2853_s25  ;;  %p2861_p9 = scmp.lt.u32.totalorder %s2853_s25, %s3448_s21 }
 0x9fb   : > { %p2855_p3 = pnand %p2854_p10, %p3578_p13 }
 0x9fc   : > { %p2860_p7 = por %p2859_p0, %p2858_p12 }
 0x9fd   : > { %p2856_p8 = pneg %p2855_p3 }
 0x9fe   : > { %p2862_p11 = por %p2861_p9, %p2860_p7 }
 0xa00   : > { %p2863_p1 = pnand %p2862_p11, %p2856_p8 }
 0xa02   : > { %2866 = shalt.err (!%p2863_p1)
}
 0xa03   : > { %2555 = dma.vmem_to_hbm [thread:$0]  (%p3578_p13), %s3450_s14, 128, %s3448_s21, %s2080_s16  }
 0xa04 PF: > { %s3579_s20 = sld [smem:[#allocation20_spill]]  ;;  %s3580_s10 = sld [smem:[#allocation25_spill]] }
 0xa05   : > { %s3581_s17 = sld [smem:[#allocation21_spill]] }
 0xa0a   : > { %s2105_s9 = sand.u32 1, %s3579_s20   ;;  %p3582_p6 = scmp.ne.s32.totalorder %s3580_s10, 0 }
 0xa0b   : > { %p3583_p5 = scmp.ge.s32.totalorder %s3581_s17, 2  ;;  %s2106_s24 = scalar_lea.sflag [#allocation4], %s2105_s9 }
 0xa0d   : > { %p2581_p2 = pnand %p3583_p5, %p3582_p6 }
 0xa0f   : > { %2900 = dma.done.wait (!%p2581_p2), %s2106_s24, 128  }
 0xa10   : > { %2902 = vsyncadd (!%p2581_p2), %s2106_s24, 4294967168  ;;  %s3584_s20 = sld [smem:[#allocation22_spill]]  ;;  %s3585_s30 = sld [smem:[#allocation23_spill]] }
 0xa11   : > { %s3586_s17 = smov %s2909_s18  ;;  %s3587_s18 = smov %s2913_s19 }
 0xa16   : > { %p29_p4 = scmp.ge.s32.totalorder %s3584_s20, 4   ;;  %s3588_s19 = smov %s3585_s30 }
 0xa18   :  { %31 = sbr.rel (!%p29_p4) target bundleno = 17 (0x11), region = 165 }
 0xa1f   :  { %2111 = vsyncpa [#allocation3], 1 }
 0xa20   :  { %2113 = vsyncpa [#allocation3 + $0x1], 1 }
 0xa21   :  { %2114 = vsyncpa [#allocation6], 1 }
 0xa22   :  { %2116 = vsyncpa [#allocation6 + $0x1], 1 }
 0xa23   :  { %2117 = vsyncpa [#allocation9], 1 }
 0xa24   :  { %2118 = vsyncpa [#allocation12], 1 }
 0xa25   :  { %2119 = vsyncpa [#allocation4], 1 }
 0xa26   :  { %2121 = vsyncpa [#allocation4 + $0x1], 1 }

</bundles_post_ra>
